<compile_context>
chip_gen: v5e
topology: v5e:2x2
jax: 0.10.0
libtpu: 0.0.40
codegen_flags: <defaults>
</compile_context>

<pallas_src>
import functools
import math

import jax
import jax.numpy as jnp
from jax.experimental import pallas as pl
from jax.experimental.pallas import tpu as pltpu


# ---------------------------------------------------------------------------
# tiling helper
# ---------------------------------------------------------------------------
def _tile(dim, target):
    """Largest tile <= target that divides dim (dims here are powers of two)."""
    t = min(dim, target)
    while dim % t:
        t //= 2
    return t


# ---------------------------------------------------------------------------
# Pallas kernels
# ---------------------------------------------------------------------------
def _matmul_kernel(x_ref, w_ref, o_ref, acc_ref):
    """y = x @ w, bf16 inputs, f32 accumulation, write-back on last K step."""
    @pl.when(pl.program_id(2) == 0)
    def _():
        acc_ref[...] = jnp.zeros_like(acc_ref)

    acc_ref[...] += jnp.dot(x_ref[...], w_ref[...],
                            preferred_element_type=jnp.float32)

    @pl.when(pl.program_id(2) == pl.num_programs(2) - 1)
    def _():
        o_ref[...] = acc_ref[...].astype(o_ref.dtype)


def pallas_matmul(x, w, out_dtype=jnp.bfloat16, tm=256, tn=256, tk=512):
    """x: (M, K), w: (K, N) -> (M, N); tiled over (M, N, K)."""
    M, K = x.shape
    Kw, N = w.shape
    assert K == Kw
    tm, tn, tk = _tile(M, tm), _tile(N, tn), _tile(K, tk)
    grid = (M // tm, N // tn, K // tk)
    return pl.pallas_call(
        _matmul_kernel,
        out_shape=jax.ShapeDtypeStruct((M, N), out_dtype),
        grid_spec=pltpu.PrefetchScalarGridSpec(
            num_scalar_prefetch=0,
            grid=grid,
            in_specs=[
                pl.BlockSpec((tm, tk), lambda i, j, k: (i, k)),
                pl.BlockSpec((tk, tn), lambda i, j, k: (k, j)),
            ],
            out_specs=pl.BlockSpec((tm, tn), lambda i, j, k: (i, j)),
            scratch_shapes=[pltpu.VMEM((tm, tn), jnp.float32)],
        ),
        compiler_params=pltpu.CompilerParams(
            dimension_semantics=("parallel", "parallel", "arbitrary")),
    )(x, w)


def _matmul_nt_kernel(x_ref, w_ref, o_ref, acc_ref):
    """y = x @ w.T (contract last dims of both) without materializing w.T."""
    @pl.when(pl.program_id(2) == 0)
    def _():
        acc_ref[...] = jnp.zeros_like(acc_ref)

    acc_ref[...] += jax.lax.dot_general(
        x_ref[...], w_ref[...], (((1,), (1,)), ((), ())),
        preferred_element_type=jnp.float32)

    @pl.when(pl.program_id(2) == pl.num_programs(2) - 1)
    def _():
        o_ref[...] = acc_ref[...].astype(o_ref.dtype)


def pallas_matmul_nt(x, w, out_dtype=jnp.float32, tm=256, tn=512, tk=512):
    """x: (M, K), w: (N, K) -> (M, N).  Used for the tied-embedding logits."""
    M, K = x.shape
    N, Kw = w.shape
    assert K == Kw
    tm, tn, tk = _tile(M, tm), _tile(N, tn), _tile(K, tk)
    grid = (M // tm, N // tn, K // tk)
    return pl.pallas_call(
        _matmul_nt_kernel,
        out_shape=jax.ShapeDtypeStruct((M, N), out_dtype),
        grid_spec=pltpu.PrefetchScalarGridSpec(
            num_scalar_prefetch=0,
            grid=grid,
            in_specs=[
                pl.BlockSpec((tm, tk), lambda i, j, k: (i, k)),
                pl.BlockSpec((tn, tk), lambda i, j, k: (j, k)),
            ],
            out_specs=pl.BlockSpec((tm, tn), lambda i, j, k: (i, j)),
            scratch_shapes=[pltpu.VMEM((tm, tn), jnp.float32)],
        ),
        compiler_params=pltpu.CompilerParams(
            dimension_semantics=("parallel", "parallel", "arbitrary")),
    )(x, w)


def _ffn_in_kernel(x_ref, w1_ref, w3_ref, o_ref, acc1_ref, acc3_ref):
    """Fused: silu(x @ w1) * (x @ w3) with a shared K reduction."""
    @pl.when(pl.program_id(2) == 0)
    def _():
        acc1_ref[...] = jnp.zeros_like(acc1_ref)
        acc3_ref[...] = jnp.zeros_like(acc3_ref)

    x = x_ref[...]
    acc1_ref[...] += jnp.dot(x, w1_ref[...], preferred_element_type=jnp.float32)
    acc3_ref[...] += jnp.dot(x, w3_ref[...], preferred_element_type=jnp.float32)

    @pl.when(pl.program_id(2) == pl.num_programs(2) - 1)
    def _():
        a = acc1_ref[...]
        b = acc3_ref[...]
        o_ref[...] = (a * jax.nn.sigmoid(a) * b).astype(o_ref.dtype)


def pallas_ffn_in(x, w1, w3, out_dtype=jnp.bfloat16, tm=256, tn=256, tk=512):
    M, K = x.shape
    Kw, N = w1.shape
    assert K == Kw and w3.shape == w1.shape
    tm, tn, tk = _tile(M, tm), _tile(N, tn), _tile(K, tk)
    grid = (M // tm, N // tn, K // tk)
    w_spec = pl.BlockSpec((tk, tn), lambda i, j, k: (k, j))
    return pl.pallas_call(
        _ffn_in_kernel,
        out_shape=jax.ShapeDtypeStruct((M, N), out_dtype),
        grid_spec=pltpu.PrefetchScalarGridSpec(
            num_scalar_prefetch=0,
            grid=grid,
            in_specs=[
                pl.BlockSpec((tm, tk), lambda i, j, k: (i, k)),
                w_spec, w_spec,
            ],
            out_specs=pl.BlockSpec((tm, tn), lambda i, j, k: (i, j)),
            scratch_shapes=[pltpu.VMEM((tm, tn), jnp.float32),
                            pltpu.VMEM((tm, tn), jnp.float32)],
        ),
        compiler_params=pltpu.CompilerParams(
            dimension_semantics=("parallel", "parallel", "arbitrary")),
    )(x, w1, w3)


def _rmsnorm_kernel(x_ref, w_ref, o_ref, *, eps):
    x = x_ref[...].astype(jnp.float32)
    ms = jnp.mean(x * x, axis=-1, keepdims=True)
    y = (x * jax.lax.rsqrt(ms + eps)) * w_ref[...].astype(jnp.float32)
    o_ref[...] = y.astype(o_ref.dtype)


def pallas_rmsnorm(x2d, w, eps, out_dtype=jnp.bfloat16, tm=256):
    """x2d: (M, D), w: (D,) -> (M, D); RMS over the last axis; row-tiled."""
    M, D = x2d.shape
    tm = _tile(M, tm)
    return pl.pallas_call(
        functools.partial(_rmsnorm_kernel, eps=eps),
        out_shape=jax.ShapeDtypeStruct((M, D), out_dtype),
        grid_spec=pltpu.PrefetchScalarGridSpec(
            num_scalar_prefetch=0,
            grid=(M // tm,),
            in_specs=[
                pl.BlockSpec((tm, D), lambda i: (i, 0)),
                pl.BlockSpec((1, D), lambda i: (0, 0)),
            ],
            out_specs=pl.BlockSpec((tm, D), lambda i: (i, 0)),
        ),
        compiler_params=pltpu.CompilerParams(
            dimension_semantics=("parallel",)),
    )(x2d, w.reshape(1, D))


def _flash_attn_kernel(q_ref, k_ref, v_ref, o_ref, m_sc, l_sc, acc_sc,
                       *, scale, tq, tkv):
    qi = pl.program_id(1)
    ki = pl.program_id(2)

    @pl.when(ki == 0)
    def _():
        m_sc[...] = jnp.full_like(m_sc, -1e30)
        l_sc[...] = jnp.zeros_like(l_sc)
        acc_sc[...] = jnp.zeros_like(acc_sc)

    # Skip kv blocks that lie entirely above the causal diagonal.
    @pl.when(ki * tkv <= qi * tq + tq - 1)
    def _():
        q = q_ref[...]                      # (tq, Dh) bf16
        k = k_ref[...]                      # (tkv, Dh) bf16
        v = v_ref[...]
        s = jax.lax.dot_general(
            q, k, (((1,), (1,)), ((), ())),
            preferred_element_type=jnp.float32) * scale
        row = qi * tq + jax.lax.broadcasted_iota(jnp.int32, (tq, tkv), 0)
        col = ki * tkv + jax.lax.broadcasted_iota(jnp.int32, (tq, tkv), 1)
        s = jnp.where(col <= row, s, -1e30)          # causal mask
        m_prev = m_sc[...]
        m_new = jnp.maximum(m_prev, jnp.max(s, axis=-1, keepdims=True))
        alpha = jnp.exp(m_prev - m_new)
        p = jnp.exp(s - m_new)
        l_sc[...] = alpha * l_sc[...] + jnp.sum(p, axis=-1, keepdims=True)
        acc_sc[...] = alpha * acc_sc[...] + jnp.dot(
            p.astype(v.dtype), v, preferred_element_type=jnp.float32)
        m_sc[...] = m_new

    @pl.when(ki == pl.num_programs(2) - 1)
    def _():
        inv_l = pl.reciprocal(l_sc[...], approx=True)
        o_ref[...] = (acc_sc[...] * inv_l).astype(o_ref.dtype)


def pallas_flash_attention(q, k, v, scale, tq=128, tkv=128):
    """q,k,v: (B*H, S, Dh) bf16 -> (B*H, S, Dh) bf16 causal flash attention."""
    BH, S, Dh = q.shape
    tq, tkv = _tile(S, tq), _tile(S, tkv)
    grid = (BH, S // tq, S // tkv)
    q_spec = pl.BlockSpec((None, tq, Dh), lambda b, qi, ki: (b, qi, 0))
    kv_spec = pl.BlockSpec((None, tkv, Dh), lambda b, qi, ki: (b, ki, 0))
    return pl.pallas_call(
        functools.partial(_flash_attn_kernel, scale=scale, tq=tq, tkv=tkv),
        out_shape=jax.ShapeDtypeStruct((BH, S, Dh), jnp.bfloat16),
        grid_spec=pltpu.PrefetchScalarGridSpec(
            num_scalar_prefetch=0,
            grid=grid,
            in_specs=[q_spec, kv_spec, kv_spec],
            out_specs=pl.BlockSpec((None, tq, Dh), lambda b, qi, ki: (b, qi, 0)),
            scratch_shapes=[pltpu.VMEM((tq, 1), jnp.float32),
                            pltpu.VMEM((tq, 1), jnp.float32),
                            pltpu.VMEM((tq, Dh), jnp.float32)],
        ),
        compiler_params=pltpu.CompilerParams(
            dimension_semantics=("parallel", "parallel", "arbitrary")),
    )(q, k, v)


# ---------------------------------------------------------------------------
# JAX glue: RoPE, embedding gather, residual wiring, parameter setup
# ---------------------------------------------------------------------------
def precompute_freqs_cis(dim, end, theta=1000000.0):
    freqs = 1.0 / theta ** (
        jnp.arange(0, dim, 2, dtype=jnp.float32)[: dim // 2] / dim)
    t = jnp.arange(end, dtype=jnp.float32)
    freqs = jnp.outer(t, freqs)
    return jnp.cos(freqs), jnp.sin(freqs)


def apply_rotary_emb(xq, xk, cos, sin):
    # xq, xk: (B, S, H, Dh); cos, sin: (S, Dh//2). Interleaved (real, imag).
    # TODO(synk): fuse RoPE into the q/k kernels with pltpu.roll instead of the
    # JAX pair reshape below (kept in JAX: minor cost at these shapes).
    def rot(x):
        xf = x.astype(jnp.float32)
        xp = xf.reshape(xf.shape[:-1] + (-1, 2))
        xr, xi = xp[..., 0], xp[..., 1]
        c = cos[None, :, None, :]
        s = sin[None, :, None, :]
        out_r = xr * c - xi * s
        out_i = xr * s + xi * c
        return jnp.stack([out_r, out_i], axis=-1).reshape(xf.shape)

    return rot(xq), rot(xk)


def attention_block(lp, x_bf16, cos, sin, cfg):
    B, S, D = x_bf16.shape
    H, Hkv, Dh = cfg["n_heads"], cfg["n_kv_heads"], cfg["head_dim"]
    eps = cfg["norm_eps"]
    xf = x_bf16.reshape(B * S, D)
    # q_norm / k_norm applied to the flat projection output (literal reference).
    xq = pallas_rmsnorm(pallas_matmul(xf, lp["wq"]), lp["q_norm"], eps)
    xk = pallas_rmsnorm(pallas_matmul(xf, lp["wk"]), lp["k_norm"], eps)
    xv = pallas_matmul(xf, lp["wv"])
    xq = xq.reshape(B, S, H, Dh)
    xk = xk.reshape(B, S, Hkv, Dh)
    xv = xv.reshape(B, S, Hkv, Dh)
    xq, xk = apply_rotary_emb(xq, xk, cos, sin)
    xq = xq.astype(jnp.bfloat16)
    xk = xk.astype(jnp.bfloat16)
    n_rep = H // Hkv
    if n_rep > 1:                              # repeat_kv (identity when n_rep==1)
        xk = jnp.repeat(xk, n_rep, axis=2)
        xv = jnp.repeat(xv, n_rep, axis=2)
    q = xq.transpose(0, 2, 1, 3).reshape(B * H, S, Dh)
    k = xk.transpose(0, 2, 1, 3).reshape(B * H, S, Dh)
    v = xv.transpose(0, 2, 1, 3).reshape(B * H, S, Dh)
    out = pallas_flash_attention(q, k, v, 1.0 / math.sqrt(Dh))
    out = out.reshape(B, H, S, Dh).transpose(0, 2, 1, 3).reshape(B * S, H * Dh)
    out = pallas_matmul(out, lp["wo"], out_dtype=jnp.float32)
    return out.reshape(B, S, D)


def feed_forward(lp, x_bf16):
    B, S, D = x_bf16.shape
    xf = x_bf16.reshape(B * S, D)
    h = pallas_ffn_in(xf, lp["w1"], lp["w3"])            # fused silu(w1x)*(w3x)
    out = pallas_matmul(h, lp["w2"], out_dtype=jnp.float32)
    return out.reshape(B, S, D)


def transformer_forward(params, tokens, cfg):
    """Inference path (targets=None): returns logits of shape (B, 1, vocab)."""
    B, S = tokens.shape
    eps = cfg["norm_eps"]
    # TODO(synk): token-embedding gather kept in plain JAX (data-dependent gather).
    h = params["tok_embeddings"][tokens].astype(jnp.float32)    # (B, S, D)
    cos = params["freqs_cos"][:S]
    sin = params["freqs_sin"][:S]
    for lp in params["layers"]:
        hn = pallas_rmsnorm(h.reshape(B * S, -1), lp["attention_norm"], eps)
        h = h + attention_block(lp, hn.reshape(B, S, -1), cos, sin, cfg)
        hn = pallas_rmsnorm(h.reshape(B * S, -1), lp["ffn_norm"], eps)
        h = h + feed_forward(lp, hn.reshape(B, S, -1))
    h_last = h[:, -1, :]                                    # (B, D) — last pos
    hn = pallas_rmsnorm(h_last, params["norm"], eps)        # (B, D) bf16
    # Tied-weight logits: contract embedding along its last dim (no .T copy).
    logits = pallas_matmul_nt(hn, params["tok_embeddings"], out_dtype=jnp.float32)
    return logits[:, None, :]                               # (B, 1, vocab)


def init_params(key, cfg):
    D, H, Hkv, Dh = cfg["dim"], cfg["n_heads"], cfg["n_kv_heads"], cfg["head_dim"]
    hidden, V, L = cfg["hidden_dim"], cfg["vocab_size"], cfg["n_layers"]
    std = 0.02
    std_res = 0.02 / math.sqrt(2 * L)              # wo.weight / w3.weight init

    def normal_bf16(k, shape, s):
        return (s * jax.random.normal(k, shape, dtype=jnp.float32)).astype(
            jnp.bfloat16)

    keys = iter(jax.random.split(key, 7 * L + 1))
    layers = []
    for _ in range(L):
        layers.append(dict(
            wq=normal_bf16(next(keys), (D, H * Dh), std),
            wk=normal_bf16(next(keys), (D, Hkv * Dh), std),
            wv=normal_bf16(next(keys), (D, Hkv * Dh), std),
            wo=normal_bf16(next(keys), (H * Dh, D), std_res),
            w1=normal_bf16(next(keys), (D, hidden), std),
            w2=normal_bf16(next(keys), (hidden, D), std),
            w3=normal_bf16(next(keys), (D, hidden), std_res),
            q_norm=jnp.ones((Dh,), jnp.float32),
            k_norm=jnp.ones((Dh,), jnp.float32),
            attention_norm=jnp.ones((D,), jnp.float32),
            ffn_norm=jnp.ones((D,), jnp.float32),
        ))
    emb = normal_bf16(next(keys), (V, D), std)     # tied: embedding == output.weight
    cos, sin = precompute_freqs_cis(D // H, cfg["max_seq_len"])
    return dict(layers=layers, tok_embeddings=emb,
                norm=jnp.ones((D,), jnp.float32),
                freqs_cos=cos, freqs_sin=sin)


# ---------------------------------------------------------------------------
# Pure-JAX reference with the same bf16/f32 dtype strategy (sanity check)
# ---------------------------------------------------------------------------
def reference_forward(params, tokens, cfg):
    f32, bf16 = jnp.float32, jnp.bfloat16
    eps = cfg["norm_eps"]

    def rms(x, w, out_dtype=bf16):
        xf = x.astype(f32)
        ms = jnp.mean(xf * xf, axis=-1, keepdims=True)
        return ((xf * jax.lax.rsqrt(ms + eps)) * w.astype(f32)).astype(out_dtype)

    def mm(a, b):
        return jnp.dot(a, b, preferred_element_type=f32)

    B, S = tokens.shape
    H, Hkv, Dh = cfg["n_heads"], cfg["n_kv_heads"], cfg["head_dim"]
    h = params["tok_embeddings"][tokens].astype(f32)
    cos, sin = params["freqs_cos"][:S], params["freqs_sin"][:S]
    for lp in params["layers"]:
        xn = rms(h, lp["attention_norm"])
        xq = rms(mm(xn, lp["wq"]).astype(bf16), lp["q_norm"])
        xk = rms(mm(xn, lp["wk"]).astype(bf16), lp["k_norm"])
        xv = mm(xn, lp["wv"]).astype(bf16)
        xq = xq.reshape(B, S, H, Dh)
        xk = xk.reshape(B, S, Hkv, Dh)
        xv = xv.reshape(B, S, Hkv, Dh)
        xq, xk = apply_rotary_emb(xq, xk, cos, sin)
        xq, xk = xq.astype(bf16), xk.astype(bf16)
        n_rep = H // Hkv
        if n_rep > 1:
            xk = jnp.repeat(xk, n_rep, axis=2)
            xv = jnp.repeat(xv, n_rep, axis=2)
        q, k, v = (t.transpose(0, 2, 1, 3) for t in (xq, xk, xv))
        s = jnp.einsum("bhqd,bhkd->bhqk", q, k,
                       preferred_element_type=f32) / math.sqrt(Dh)
        mask = jnp.tril(jnp.ones((S, S), bool))
        s = jnp.where(mask[None, None], s, -jnp.inf)
        p = jax.nn.softmax(s, axis=-1)
        o = jnp.einsum("bhqk,bhkd->bhqd", p.astype(bf16), v,
                       preferred_element_type=f32)
        o = o.astype(bf16).transpose(0, 2, 1, 3).reshape(B, S, H * Dh)
        h = h + mm(o, lp["wo"])
        xn = rms(h, lp["ffn_norm"])
        a, b = mm(xn, lp["w1"]), mm(xn, lp["w3"])
        hsw = (a * jax.nn.sigmoid(a) * b).astype(bf16)
        h = h + mm(hsw, lp["w2"])
    hl = rms(h[:, -1, :], params["norm"])
    logits = jax.lax.dot_general(hl, params["tok_embeddings"],
                                 (((1,), (1,)), ((), ())),
                                 preferred_element_type=f32)
    return logits[:, None, :]


# ---------------------------------------------------------------------------
if __name__ == "__main__":
    # Small, self-consistent config (see NOTE at top of file).
    cfg = dict(dim=128, n_layers=2, n_heads=1, n_kv_heads=1, head_dim=128,
               vocab_size=512, hidden_dim=256, norm_eps=1e-6, max_seq_len=64)

    root = jax.random.PRNGKey(0)
    pkey, tkey = jax.random.split(root)
    params = init_params(pkey, cfg)
    tokens = jax.random.randint(tkey, (2, 8), 0, cfg["vocab_size"],
                                dtype=jnp.int32)

    logits = transformer_forward(params, tokens, cfg)
    logits = jax.block_until_ready(logits)

    assert logits.shape == (2, 1, cfg["vocab_size"]), logits.shape
    assert bool(jnp.all(jnp.isfinite(logits)))

    ref = jax.block_until_ready(reference_forward(params, tokens, cfg))
    err = float(jnp.max(jnp.abs(logits - ref)))
    assert jnp.allclose(logits, ref, rtol=2e-2, atol=2e-2), err

    print("KERNEL_OK")
</pallas_src>

<mosaic_0001>
module attributes {stable_mosaic.version = 11 : i64} {
  func.func @_rmsnorm_kernel(%arg0: i32, %arg1: memref<16x128xf32, #tpu.memory_space<vmem>>, %arg2: memref<1x128xf32, #tpu.memory_space<vmem>>, %arg3: memref<16x128xbf16, #tpu.memory_space<vmem>>) attributes {dimension_semantics = [#tpu.dimension_semantics<parallel>], iteration_bounds = array<i64: 1>, scalar_prefetch = 0 : i64, scratch_operands = 0 : i64, tpu.core_type = #tpu.core_type<tc>, window_params = [{transform_indices = @transform_0, window_bounds = array<i64: 16, 128>}, {pipeline_mode = #tpu.pipeline_mode<synchronous>, transform_indices = @transform_1, window_bounds = array<i64: 1, 128>}, {transform_indices = @transform_2, window_bounds = array<i64: 16, 128>}]} {
    %c0 = arith.constant 0 : index
    %c0_0 = arith.constant 0 : index
    %0 = vector.load %arg1[%c0, %c0_0] : memref<16x128xf32, #tpu.memory_space<vmem>>, vector<16x128xf32>
    %1 = arith.mulf %0, %0 : vector<16x128xf32>
    %cst = arith.constant dense<0.000000e+00> : vector<16xf32>
    %2 = vector.multi_reduction <add>, %1, %cst [1] : vector<16x128xf32> to vector<16xf32>
    %3 = vector.shape_cast %2 : vector<16xf32> to vector<16x1xf32>
    %cst_1 = arith.constant 1.280000e+02 : f32
    %4 = vector.broadcast %cst_1 : f32 to vector<16x1xf32>
    %5 = arith.divf %3, %4 : vector<16x1xf32>
    %cst_2 = arith.constant 9.99999997E-7 : f32
    %6 = vector.broadcast %cst_2 : f32 to vector<16x1xf32>
    %7 = arith.addf %5, %6 : vector<16x1xf32>
    %8 = math.rsqrt %7 : vector<16x1xf32>
    %9 = vector.broadcast %8 : vector<16x1xf32> to vector<16x128xf32>
    %10 = arith.mulf %0, %9 : vector<16x128xf32>
    %c0_3 = arith.constant 0 : index
    %c0_4 = arith.constant 0 : index
    %11 = vector.load %arg2[%c0_3, %c0_4] : memref<1x128xf32, #tpu.memory_space<vmem>>, vector<1x128xf32>
    %12 = vector.broadcast %11 : vector<1x128xf32> to vector<16x128xf32>
    %13 = arith.mulf %10, %12 : vector<16x128xf32>
    %14 = arith.truncf %13 : vector<16x128xf32> to vector<16x128xbf16>
    %c0_5 = arith.constant 0 : index
    %c0_6 = arith.constant 0 : index
    %15 = vector.load %arg3[%c0_5, %c0_6] : memref<16x128xbf16, #tpu.memory_space<vmem>>, vector<16x128xbf16>
    tpu.vector_store %arg3[%c0_5, %c0_6], %14 {strides = array<i32>} : memref<16x128xbf16, #tpu.memory_space<vmem>>, vector<16x128xbf16>,
    return
  }
  func.func @transform_0(%arg0: i32) -> (i32, i32) {
    %c0_i32 = arith.constant 0 : i32
    %c0_i32_0 = arith.constant 0 : i32
    return %arg0, %c0_i32 : i32, i32
  }
  func.func @transform_1(%arg0: i32) -> (i32, i32) {
    %c0_i32 = arith.constant 0 : i32
    %c0_i32_0 = arith.constant 0 : i32
    %c0_i32_1 = arith.constant 0 : i32
    return %c0_i32, %c0_i32_0 : i32, i32
  }
  func.func @transform_2(%arg0: i32) -> (i32, i32) {
    %c0_i32 = arith.constant 0 : i32
    %c0_i32_0 = arith.constant 0 : i32
    return %arg0, %c0_i32 : i32, i32
  }
}

</mosaic_0001>

<bundles_post_ra>
// kernel: tpu_custom_call.1
= control target key start
LH: loop header
LB: loop body
LE: loop exit
PB: predicated region body
PF: predicated region fallthrough
CT: control target
= control target key end

     0   :  { %7 = vsyncpa [#allocation3], 0  ;;  %s243_s0 = inlined_call_operand.hbm [shape: f32[16,128], index: 0, kind: input, shape index: {}]   ;;  %s244_s1 = inlined_call_operand.hbm [shape: f32[1,128], index: 1, kind: input, shape index: {}]   ;;  %s245_s2 = inlined_call_operand.hbm [shape: bf16[16,128], index: 2, kind: output, shape index: {}]  }
   0x1   :  { %8 = vsyncpa [#allocation6], 0 }
   0x2   :  { %9 = vsyncpa [#allocation4], 0  ;;  %s14_s11 = sshll.u32 %s243_s0, 4  ;;  %s211_s12 = smov [#allocation2]   ;;  %s15_s11 = int_to_ptr.hbm [resolvable:$true] %s14_s11 }
   0x3   :  { %s16_s13 = sshll.u32 %s211_s12, 4  ;;  %s28_s16 = sshll.u32 %s244_s1, 4  ;;  %s17_s13 = int_to_ptr.vmem [resolvable:$true] %s16_s13  ;;  %s29_s16 = int_to_ptr.hbm [resolvable:$true] %s28_s16 }
   0x4   :  { %s212_s17 = smov 128   ;;  %s213_s18 = smov 8  }
   0x5   :  { %22 = dma.hbm_to_vmem [thread:$0]  %s15_s11, 256, %s17_s13, [#allocation3], %s212_s17, %s212_s17, %s213_s18  }
   0x6   :  { %s214_s19 = smov [#allocation5]  }
   0x7   :  { %s30_s20 = sshll.u32 %s214_s19, 4  ;;  %s31_s20 = int_to_ptr.vmem [resolvable:$true] %s30_s20 }
   0x8   :  { %33 = dma.hbm_to_vmem [thread:$0]  %s29_s16, 16, %s31_s20, [#allocation6]  }
   0x9   :  { %205 = dma.done.wait [#allocation3], 256  }
   0xa   :  { %206 = vsyncadd [#allocation3], 4294967040 }
   0xb   :  { %207 = dma.done.wait [#allocation6], 16  }
   0xc   :  { %208 = vsyncadd [#allocation6], 4294967280  ;;  %v42_v0 = vld [vmem:[#allocation2] sm:$0xff]  ;;  %v43_v2 = vld [vmem:[#allocation2 + $0x8] sm:$0xff]  ;;  %v215_v4 = vmov 128.0   ;;  %s216_s0 = smov [#allocation7]  }
   0xd   :  { %v44_v1 = vmul.f32 %v42_v0, %v42_v0  ;;  %v45_v3 = vmul.f32 %v43_v2, %v43_v2  ;;  %127 = vrcp.f32 %v215_v4  ;;  %v126_v30 = vld [vmem:[#allocation5] ss:$0 sm:$0xff]  ;;  %s97_s1 = sshll.u32 %s216_s0, 4  ;;  %s99_s23 = sshll.u32 %s245_s2, 4  ;;  %s98_s1 = int_to_ptr.vmem [resolvable:$true] %s97_s1  ;;  %s100_s23 = int_to_ptr.hbm [resolvable:$true] %s99_s23 }
   0xe   :  { %s217_s24 = smov 64   ;;  %s218_s25 = smov 4  }
   0xf   :  { %46 = vadd.xlane.f32.xlu0 %v44_v1 }
  0x13   :  { %v128_v5 = vpop.eup %127 }
  0x14   :  { %v51_v6 = vmul.f32 128.0, %v128_v5  ;;  %vm55_vm0 = vweird.f32 %v128_v5 }
  0x16   :  { %v52_v7 = vsub.f32 1.0, %v51_v6 }
  0x17   :  { %48 = vadd.xlane.f32.xlu0 %v45_v3 }
  0x18   :  { %v53_v8 = vmul.f32 %v128_v5, %v52_v7 }
  0x1a   :  { %v54_v9 = vadd.f32 %v128_v5, %v53_v8 }
  0x1c   :  { %v56_v10 = vsel %vm55_vm0, %v128_v5, %v54_v9 }
  0x82   :  { %v47_v11 = vpop.xlane.xlu0 %46 }
  0x83   :  { %v57_v12 = vmul.f32 %v56_v10, %v47_v11 }
  0x85   :  { %v59_v13 = vadd.f32 1e-06, %v57_v12 }
  0x87   :  { %129 = vrsqrt.f32 %v59_v13  ;;  %vm67_vm2 = vweird.f32 %v59_v13 }
  0x8a   :  { %v49_v14 = vpop.xlane.xlu0 %48 }
  0x8b   :  { %v58_v15 = vmul.f32 %v56_v10, %v49_v14 }
  0x8d   :  { %v130_v16 = vpop.eup %129  ;;  %v60_v17 = vadd.f32 1e-06, %v58_v15 }
  0x8e   :  { %v62_v18 = vmul.f32 %v130_v16, %v59_v13  ;;  %vm68_vm1 = vweird.f32 %v130_v16 }
  0x8f   :  { %131 = vrsqrt.f32 %v60_v17  ;;  %vm69_vm3 = vmor %vm67_vm2, %vm68_vm1  ;;  %vm77_vm5 = vweird.f32 %v60_v17 }
  0x90   :  { %v63_v19 = vmul.f32 %v130_v16, %v62_v18 }
  0x92   :  { %v64_v20 = vmul.f32 0.5, %v63_v19 }
  0x94   :  { %v65_v21 = vsub.f32 1.5, %v64_v20 }
  0x95   :  { %v132_v22 = vpop.eup %131 }
  0x96   :  { %v72_v23 = vmul.f32 %v132_v22, %v60_v17  ;;  %v66_v24 = vmul.f32 %v130_v16, %v65_v21  ;;  %vm78_vm4 = vweird.f32 %v132_v22 }
  0x97   :  { %vm79_vm6 = vmor %vm77_vm5, %vm78_vm4 }
  0x98   :  { %v73_v25 = vmul.f32 %v132_v22, %v72_v23  ;;  %v70_v27 = vsel %vm69_vm3, %v130_v16, %v66_v24 }
  0x99   :  { %v81_v31 = vmul.f32 %v70_v27, %v42_v0 }
  0x9a   :  { %v74_v26 = vmul.f32 0.5, %v73_v25 }
  0x9b   :  { %v87_v34 = vmul.f32 %v126_v30, %v81_v31 }
  0x9c   :  { %v75_v28 = vsub.f32 1.5, %v74_v26 }
  0x9e   :  { %v76_v29 = vmul.f32 %v132_v22, %v75_v28 }
  0xa0   :  { %v80_v32 = vsel %vm79_vm6, %v132_v22, %v76_v29 }
  0xa1   :  { %v82_v33 = vmul.f32 %v80_v32, %v43_v2 }
  0xa3   :  { %v88_v35 = vmul.f32 %v126_v30, %v82_v33 }
  0xa5   :  { %v116_v36 = vpack.c.bf16 %v88_v35, %v87_v34 }
  0xa7   :  { %117 = vst [vmem:[#allocation7] sm:$0xff] %v116_v36  }
  0xa8   :  { %105 = dma.vmem_to_hbm [thread:$0]  %s98_s1, 128, %s100_s23, [#allocation4], %s217_s24, %s217_s24, %s218_s25  }
  0xa9   :  { %209 = dma.done.wait [#allocation4], 128  }
  0xaa   :  { %210 = vsyncadd [#allocation4], 4294967168 }
  0xab   :  { %110 = vsyncpa [#allocation3], 1 }
  0xac   :  { %111 = vsyncpa [#allocation6], 1 }
  0xad   :  { %112 = vsyncpa [#allocation4], 1 }

</bundles_post_ra>
